<compile_context>
chip_gen: v7x
topology: tpu7x:2x2x1
jax: 0.10.0
libtpu: 0.0.40
codegen_flags: <defaults>
</compile_context>

<pallas_src>
import jax
import jax.numpy as jnp
from jax.experimental import pallas as pl
from jax.experimental.pallas import tpu as pltpu


def _round_up(x, m):
    return ((x + m - 1) // m) * m


def _mean_kernel(x_ref, w_ref, b_ref, mean_ref):
    # (tb, d_in) @ (d_in, d_out) on the MXU with f32 accumulate; bias + tanh on VPU/EUP.
    z = jnp.dot(x_ref[...], w_ref[...], preferred_element_type=jnp.float32)
    mean_ref[...] = jnp.tanh(z + b_ref[...]).astype(mean_ref.dtype)


def _meanT_kernel(xT_ref, wT_ref, bT_ref, meanT_ref):
    # Lane-dense variant: output block is (d_out, tb) -> batch tile lives on the lanes.
    z = jnp.dot(wT_ref[...], xT_ref[...], preferred_element_type=jnp.float32)
    meanT_ref[...] = jnp.tanh(z + bT_ref[...]).astype(meanT_ref.dtype)


def _pick_batch_tile(B, bytes_per_row, *, target, align, vmem_budget_bytes):
    """Batch tile selection:
      - ~`target` rows (multiple of `align`),
      - >= 2 grid steps whenever B allows it (v7x has 2 TensorCores; "parallel"
        grid axes are sharded across them),
      - capped so the double-buffered per-tile streams fit a v5e-safe VMEM budget.
    """
    tb = max(align, min(_round_up(target, align), _round_up(pl.cdiv(B, 2), align)))
    while tb > align and 2 * tb * bytes_per_row > vmem_budget_bytes:
        tb = max(align, _round_up(tb // 2, align))
    return tb


def diag_gaussian(x, w, b, logstd_bias, *,
                  compute_dtype=jnp.float32,
                  out_dtype=jnp.float32,
                  target_batch_tile=512,
                  vmem_budget_bytes=12 << 20):
    """DiagGaussian head.

    mean    = tanh(x @ w + b)          (Pallas kernel, batch-tiled, cdiv grid)
    std_row = exp(tanh(logstd_bias))   (batch-independent, plain JAX, shape (1, d_out))

    Returns (mean (B, d_out), std_row (1, d_out)). Normal(mean, std_row) broadcasts
    to the same distribution as the PyTorch module's Normal(action_mean, logstd.exp()).
    Set compute_dtype=jnp.bfloat16 to halve the dominant HBM read of x (matmul
    accumulate / bias / tanh stay f32); set out_dtype=jnp.bfloat16 if the consumer
    tolerates a bf16 mean.
    """
    B, d_in = x.shape
    d_out = w.shape[1]

    xc = x.astype(compute_dtype)
    wc = w.astype(compute_dtype)
    bc = b.astype(jnp.float32).reshape(1, d_out)

    # Lane-padded VMEM accounting: a (tb, d_in) tile occupies tb * round_up(d_in,128)
    # elements in VMEM (lanes pad to 128) — NOT tb * d_in.
    x_itemsize = jnp.dtype(compute_dtype).itemsize
    o_itemsize = jnp.dtype(out_dtype).itemsize
    bytes_per_row = (_round_up(d_in, 128) * x_itemsize
                     + _round_up(d_out, 128) * o_itemsize)
    tb = _pick_batch_tile(B, bytes_per_row, target=target_batch_tile, align=8,
                          vmem_budget_bytes=vmem_budget_bytes)
    # Ragged last block: padded rows compute garbage and are dropped on writeback.
    grid = (pl.cdiv(B, tb),)

    cost = pl.CostEstimate(
        flops=2 * B * d_in * d_out,
        transcendentals=B * d_out,
        bytes_accessed=(B * d_in * x_itemsize + d_in * d_out * x_itemsize
                        + d_out * 4 + B * d_out * o_itemsize),
    )

    mean = pl.pallas_call(
        _mean_kernel,
        out_shape=jax.ShapeDtypeStruct((B, d_out), out_dtype),
        grid=grid,
        in_specs=[
            pl.BlockSpec((tb, d_in), lambda i: (i, 0)),      # x: batch-tiled
            pl.BlockSpec((d_in, d_out), lambda i: (0, 0)),   # W: resident
            pl.BlockSpec((1, d_out), lambda i: (0, 0)),      # bias: resident
        ],
        out_specs=pl.BlockSpec((tb, d_out), lambda i: (i, 0)),
        compiler_params=pltpu.CompilerParams(dimension_semantics=("parallel",)),
        cost_estimate=cost,
    )(xc, wc, bc)

    # Batch-independent std: return the (1, d_out) row; do NOT materialize a
    # (B, d_out) broadcast in HBM (it would cost a full extra write + later read).
    std_row = jnp.exp(jnp.tanh(logstd_bias.astype(jnp.float32))).reshape(1, d_out)
    return mean, std_row


def diag_gaussian_transposed(xT, w, b, logstd_bias, *,
                             compute_dtype=jnp.float32,
                             out_dtype=jnp.float32,
                             target_batch_tile=512,
                             vmem_budget_bytes=12 << 20):
    """Lane-dense formulation for producers that hand over x^T (d_in, B).

    Computes mean^T = tanh(W^T @ x^T + b) with output block (d_out, tb): the batch
    tile sits on the 128-lane axis, so stores are unmasked full-lane vst instead of
    16/128-lane masked stores. Returns (mean^T (d_out, B), std_row (1, d_out)).
    """
    d_in, B = xT.shape
    d_out = w.shape[1]

    xc = xT.astype(compute_dtype)
    wT = jnp.transpose(w).astype(compute_dtype)      # (d_out, d_in), tiny, resident
    bT = b.astype(jnp.float32).reshape(d_out, 1)

    x_itemsize = jnp.dtype(compute_dtype).itemsize
    o_itemsize = jnp.dtype(out_dtype).itemsize
    # Here the lane dim is the batch tile (multiple of 128): rows only pad sublanes.
    bytes_per_col = (_round_up(d_in, 8) * x_itemsize
                     + _round_up(d_out, 8) * o_itemsize)
    tb = _pick_batch_tile(B, bytes_per_col, target=target_batch_tile, align=128,
                          vmem_budget_bytes=vmem_budget_bytes)
    grid = (pl.cdiv(B, tb),)

    cost = pl.CostEstimate(
        flops=2 * B * d_in * d_out,
        transcendentals=B * d_out,
        bytes_accessed=(B * d_in * x_itemsize + d_in * d_out * x_itemsize
                        + d_out * 4 + B * d_out * o_itemsize),
    )

    meanT = pl.pallas_call(
        _meanT_kernel,
        out_shape=jax.ShapeDtypeStruct((d_out, B), out_dtype),
        grid=grid,
        in_specs=[
            pl.BlockSpec((d_in, tb), lambda i: (0, i)),      # x^T: batch-tiled on lanes
            pl.BlockSpec((d_out, d_in), lambda i: (0, 0)),   # W^T: resident
            pl.BlockSpec((d_out, 1), lambda i: (0, 0)),      # bias column: resident
        ],
        out_specs=pl.BlockSpec((d_out, tb), lambda i: (0, i)),
        compiler_params=pltpu.CompilerParams(dimension_semantics=("parallel",)),
        cost_estimate=cost,
    )(xc, wT, bT)

    std_row = jnp.exp(jnp.tanh(logstd_bias.astype(jnp.float32))).reshape(1, d_out)
    return meanT, std_row


def init_normc(key, shape):
    # init_normc_: sample N(0,1), then normalize each output unit's fan-in vector
    # to unit norm. Weight stored as (in, out) -> normalize along axis 0.
    w = jax.random.normal(key, shape, dtype=jnp.float32)
    w = w / jnp.sqrt(jnp.sum(jnp.square(w), axis=0, keepdims=True))
    return w


if __name__ == "__main__":
    key = jax.random.PRNGKey(0)
    k_x, k_w, k_x2, k_x3 = jax.random.split(key, 4)

    input_size, output_size = 32, 16

    # Deterministic parameters matching the module __init__:
    #   fc_mean weight: init_normc_, bias: constant 0; logstd (AddBias): zeros.
    w = init_normc(k_w, (input_size, output_size))
    b = jnp.zeros((output_size,), dtype=jnp.float32)
    logstd_bias = jnp.zeros((output_size,), dtype=jnp.float32)

    def ref(xx):
        m = jnp.tanh(xx @ w + b[None, :])
        s = jnp.exp(jnp.tanh(logstd_bias))[None, :]
        return m, s

    # 1) Small batch, f32 (exact PyTorch semantics).
    B = 8
    x = jax.random.normal(k_x, (B, input_size), dtype=jnp.float32)
    mean, std_row = diag_gaussian(x, w, b, logstd_bias)
    jax.block_until_ready((mean, std_row))
    rm, rs = ref(x)
    assert jnp.allclose(mean, rm, atol=1e-5, rtol=1e-5)
    assert jnp.allclose(std_row, rs, atol=1e-6)
    # Normal(mean, std_row) broadcasts to the same (B, d_out) std as the module.
    assert jnp.allclose(jnp.broadcast_to(std_row, mean.shape),
                        jnp.broadcast_to(rs, rm.shape))

    # 2) Ragged cdiv grid (B not a multiple of the tile) with >= 2 parallel steps.
    B2 = 200
    x2 = jax.random.normal(k_x2, (B2, input_size), dtype=jnp.float32)
    mean2, _ = diag_gaussian(x2, w, b, logstd_bias, target_batch_tile=64)
    jax.block_until_ready(mean2)
    assert mean2.shape == (B2, output_size)
    assert jnp.allclose(mean2, ref(x2)[0], atol=1e-5, rtol=1e-5)

    # 3) bf16 matmul operands (f32 accumulate + f32 tanh) — halves the x read stream.
    mean_bf, _ = diag_gaussian(x2, w, b, logstd_bias,
                               compute_dtype=jnp.bfloat16, target_batch_tile=64)
    jax.block_until_ready(mean_bf)
    assert jnp.allclose(mean_bf, ref(x2)[0], atol=2e-2, rtol=2e-2)

    # 4) Lane-dense transposed formulation (producer hands over x^T).
    B3 = 384
    x3 = jax.random.normal(k_x3, (B3, input_size), dtype=jnp.float32)
    meanT, stdT_row = diag_gaussian_transposed(x3.T, w, b, logstd_bias,
                                               target_batch_tile=256)
    jax.block_until_ready((meanT, stdT_row))
    assert meanT.shape == (output_size, B3)
    assert jnp.allclose(jnp.transpose(meanT), ref(x3)[0], atol=1e-5, rtol=1e-5)
    assert jnp.allclose(stdT_row, rs, atol=1e-6)

    # TODO(synk): torch.distributions.Normal object itself has no Pallas equivalent;
    # we return its (mean, std) parameterization instead.
    print("KERNEL_OK")
</pallas_src>

<mosaic_0001>
module attributes {stable_mosaic.version = 11 : i64} {
  func.func @_mean_kernel(%arg0: i32, %arg1: memref<8x32xf32, #tpu.memory_space<vmem>>, %arg2: memref<32x16xf32, #tpu.memory_space<vmem>>, %arg3: memref<1x16xf32, #tpu.memory_space<vmem>>, %arg4: memref<8x16xf32, #tpu.memory_space<vmem>>) attributes {dimension_semantics = [#tpu.dimension_semantics<parallel>], iteration_bounds = array<i64: 1>, scalar_prefetch = 0 : i64, scratch_operands = 0 : i64, tpu.core_type = #tpu.core_type<tc>, window_params = [{transform_indices = @transform_0, window_bounds = array<i64: 8, 32>}, {pipeline_mode = #tpu.pipeline_mode<synchronous>, transform_indices = @transform_1, window_bounds = array<i64: 32, 16>}, {pipeline_mode = #tpu.pipeline_mode<synchronous>, transform_indices = @transform_2, window_bounds = array<i64: 1, 16>}, {transform_indices = @transform_3, window_bounds = array<i64: 8, 16>}]} {
    %c0 = arith.constant 0 : index
    %c0_0 = arith.constant 0 : index
    %0 = vector.load %arg1[%c0, %c0_0] : memref<8x32xf32, #tpu.memory_space<vmem>>, vector<8x32xf32>
    %c0_1 = arith.constant 0 : index
    %c0_2 = arith.constant 0 : index
    %1 = vector.load %arg2[%c0_1, %c0_2] : memref<32x16xf32, #tpu.memory_space<vmem>>, vector<32x16xf32>
    %cst = arith.constant dense<0.000000e+00> : vector<8x16xf32>
    %2 = tpu.matmul %0, %1, %cst {dimension_numbers = #tpu.dot_dimension_numbers<[1], [0], [0], [1], [0, 0, 1, 1], [], []>} : vector<8x32xf32>, vector<32x16xf32>, vector<8x16xf32> -> vector<8x16xf32>
    %c0_3 = arith.constant 0 : index
    %c0_4 = arith.constant 0 : index
    %3 = vector.load %arg3[%c0_3, %c0_4] : memref<1x16xf32, #tpu.memory_space<vmem>>, vector<1x16xf32>
    %4 = vector.broadcast %3 : vector<1x16xf32> to vector<8x16xf32>
    %5 = arith.addf %2, %4 : vector<8x16xf32>
    %6 = math.tanh %5 : vector<8x16xf32>
    %c0_5 = arith.constant 0 : index
    %c0_6 = arith.constant 0 : index
    %7 = vector.load %arg4[%c0_5, %c0_6] : memref<8x16xf32, #tpu.memory_space<vmem>>, vector<8x16xf32>
    tpu.vector_store %arg4[%c0_5, %c0_6], %6 {strides = array<i32>} : memref<8x16xf32, #tpu.memory_space<vmem>>, vector<8x16xf32>,
    return
  }
  func.func @transform_0(%arg0: i32) -> (i32, i32) {
    %c0_i32 = arith.constant 0 : i32
    %c0_i32_0 = arith.constant 0 : i32
    return %arg0, %c0_i32 : i32, i32
  }
  func.func @transform_1(%arg0: i32) -> (i32, i32) {
    %c0_i32 = arith.constant 0 : i32
    %c0_i32_0 = arith.constant 0 : i32
    %c0_i32_1 = arith.constant 0 : i32
    return %c0_i32, %c0_i32_0 : i32, i32
  }
  func.func @transform_2(%arg0: i32) -> (i32, i32) {
    %c0_i32 = arith.constant 0 : i32
    %c0_i32_0 = arith.constant 0 : i32
    %c0_i32_1 = arith.constant 0 : i32
    return %c0_i32, %c0_i32_0 : i32, i32
  }
  func.func @transform_3(%arg0: i32) -> (i32, i32) {
    %c0_i32 = arith.constant 0 : i32
    %c0_i32_0 = arith.constant 0 : i32
    return %arg0, %c0_i32 : i32, i32
  }
}

</mosaic_0001>

<bundles_post_ra>
// kernel: tpu_custom_call.1
= control target key start
LH: loop header
LB: loop body
LE: loop exit
PB: predicated region body
PF: predicated region fallthrough
CT: control target
= control target key end

     0   :  { %v172_v3 = vmov 0.0|0.0   ;;  %vm173_vm0 = vmmov 0   ;;  %v174_v6 = vmov 0.0   ;;  %s226_s0 = inlined_call_operand.vmem [shape: f32[8,32], index: 0, kind: input, shape index: {}]   ;;  %s227_s1 = inlined_call_operand.vmem [shape: f32[32,16], index: 1, kind: input, shape index: {}]   ;;  %s228_s2 = inlined_call_operand.vmem [shape: f32[1,16], index: 2, kind: input, shape index: {}]   ;;  %s229_s3 = inlined_call_operand.hbm [shape: f32[8,16], index: 3, kind: output, shape index: {}]  }
   0x1   :  { %v16_v0 = vld [vmem:[%s227_s1] sm:$0xff]  ;;  %v17_v1 = vld [vmem:[%s227_s1 + $0x8] sm:$0xff]  ;;  %v18_v2 = vld [vmem:[%s227_s1 + $0x10] sm:$0xff]  ;;  %136 = vmatprep.subr.bf16.mxu0 %v172_v3  ;;  %133 = vmatprep.mubr.msk.f32.mxu0 %vm173_vm0, %v174_v6 }
   0x2   :  { %v137_v4 = vpack.c.bf16 %v17_v1, %v16_v0  ;;  %v19_v5 = vld [vmem:[%s227_s1 + $0x18] sm:$0xff] }
   0x3   :  { %8 = vsyncpa [#allocation3], 0  ;;  %v140_v7 = vpack.c.bf16 %v19_v5, %v18_v2  ;;  %v15_v8 = vld [vmem:[%s226_s0] sm:$0xff]  ;;  %vm27_vm1 = vcmask 261120   ;;  %s175_s1 = smov [#allocation2]   ;;  %vm102_vm2 = vcmask 130048  }
   0x4   :  { %138 = vmatpush3.bf16.msra.mxu0 %v137_v4  ;;  %v118_v9 = vld [vmem:[%s228_s2] ss:$0 sm:$0xff]  ;;  %s110_s24 = sshll.u32 %s175_s1, 4  ;;  %s111_s24 = int_to_ptr.vmem [resolvable:$true] %s110_s24 }
   0x5   :  { %139 = vmatprep.subr.bf16.mxu0 %v172_v3  ;;  %s148_s25 = scalar_lea.vmem %s111_s24, 128  ;;  %p153_p1 = scmp.lt.s32.totalorder %s111_s24, %s111_s24 }
   0x6   :  { %p149_p0 = scmp.ne.s32.totalorder %s111_s24, %s148_s25  ;;  %p154_p2 = scmp.lt.s32.totalorder %s148_s25, %s148_s25 }
   0x8   :  { %141 = vmatpush3.bf16.msra.mxu0 %v140_v7  ;;  %p155_p3 = por %p154_p2, %p153_p1 }
   0xa   :  { %p156_p4 = pnand %p155_p3, %p149_p0 }
   0xb   :  { %134 = vmatmul.mubr.msk.f32.vlgmr.msra.gmra.mrb[0].mxu0 %vm27_vm1, %v15_v8 }
  0xde   :  { %v97_v10 = vpop.f32.mrb[0].mxu0 }
  0xdf   :  { %v98_v11 = vadd.f32 %v118_v9, %v97_v10  ;;  %v135_v12 = vpop.f32.mrb[1].mxu0 }
  0xe1   :  { %146 = vtanh.f32 %v98_v11 }
  0xeb   :  { %v147_v13 = vpop.eup %146 }
  0xec   :  { %103 = vst.msk [vmem:[#allocation2] sm:$0xff] %vm102_vm2, %v147_v13 }
  0xed   :  { %159 = shalt.err (!%p156_p4)
}
  0xee   :  { %s160_s2 = scalar_lea.hbm %s229_s3, 128 }
  0xef   :  { %p161_p5 = scmp.ne.s32.totalorder %s229_s3, %s160_s2  ;;  %p164_p6 = scmp.lt.u32.totalorder %s160_s2, %s229_s3 }
  0xf1   :  { %p166_p7 = pnand %p164_p6, %p161_p5 }
  0xf3   :  { %169 = shalt.err (!%p166_p7)
}
  0xf4   :  { %113 = dma.vmem_to_hbm [thread:$0]  %s111_s24, 128, %s229_s3, [#allocation3]  }
  0xf5   :  { %170 = dma.done.wait [#allocation3], 128  }
  0xf6   :  { %171 = vsyncadd [#allocation3], 4294967168 }
  0xf7   :  { %117 = vsyncpa [#allocation3], 1 }

</bundles_post_ra>
